<compile_context>
chip_gen: v7x
topology: tpu7x:2x2x1
jax: 0.10.0
libtpu: 0.0.40
codegen_flags: <defaults>
</compile_context>

<pallas_src>
import jax
import jax.numpy as jnp
from jax.experimental import pallas as pl
from jax.experimental.pallas import tpu as pltpu


_INV_SQRT2 = 0.7071067811865476


def _erf(x):
    # Abramowitz & Stegun 7.1.26, |error| <= 1.5e-7 (exact at f32 precision).
    a1, a2, a3, a4, a5 = (0.254829592, -0.284496736, 1.421413741,
                          -1.453152027, 1.061405429)
    p = 0.3275911
    ax = jnp.abs(x)
    # EUP reciprocal: keeps the divide off the VALU slot (this runs on the
    # largest (R, FF) tensor); error is damped by the downstream LayerNorm.
    t = pl.reciprocal(1.0 + p * ax, approx=True)
    poly = ((((a5 * t + a4) * t + a3) * t + a2) * t + a1) * t
    y = 1.0 - poly * jnp.exp(-ax * ax)
    return jnp.where(x >= 0, y, -y)


def _gelu_exact(x):
    # torch.nn.GELU() default ('none'): 0.5 * x * (1 + erf(x / sqrt(2)))
    return 0.5 * x * (1.0 + _erf(x * _INV_SQRT2))


# ----------------------------------------------------------------------------
# Pallas kernel: R rows of the flattened input per grid step
# ----------------------------------------------------------------------------
def ffn_kernel(x_ref, w1_ref, b1_ref, w2_ref, b2_ref, gamma_ref, beta_ref,
               o_ref):
    x_bf = x_ref[...]                                            # (R, H) bf16

    # linear1: bf16 MXU matmul, f32 accumulate; exact-erf GELU in f32.
    h = jnp.dot(x_bf, w1_ref[...],
                preferred_element_type=jnp.float32) + b1_ref[...]   # (R, FF) f32
    h = _gelu_exact(h)

    # linear2: bf16 MXU matmul, f32 accumulate.
    y = jnp.dot(h.astype(jnp.bfloat16), w2_ref[...],
                preferred_element_type=jnp.float32) + b2_ref[...]   # (R, H) f32

    # residual + LayerNorm over the hidden dim (eps = 1e-5, nn.LayerNorm
    # default), single pass over r: var = E[r^2] - mean^2.
    r = y + x_bf.astype(jnp.float32)
    mean = jnp.mean(r, axis=-1, keepdims=True)
    var = jnp.mean(r * r, axis=-1, keepdims=True) - mean * mean
    n = (r - mean) * jax.lax.rsqrt(var + 1e-5)
    o_ref[...] = (n * gamma_ref[...] + beta_ref[...]).astype(o_ref.dtype)


# ----------------------------------------------------------------------------
# Helpers
# ----------------------------------------------------------------------------
def _vmem_limit_bytes():
    # ~75% of physical VMEM (v5e/v6e: 128 MiB -> 96 MiB, v7x: 64 MiB/TC ->
    # 48 MiB), leaving headroom for the streamed x/out double buffers, the
    # (R, FF) f32 intermediate and Mosaic internal scratch.
    try:
        return int(pltpu.get_tpu_info().vmem_capacity_bytes * 3 // 4)
    except Exception:
        return 32 * 1024 * 1024


def _resident_spec(shape):
    # Weights / biases / LN params keep the same block index for every grid
    # step -> single-buffer them (the default second buffer is wasted VMEM).
    try:
        return pl.BlockSpec(shape, lambda i: (0, 0),
                            pipeline_mode=pl.Buffered(1))
    except TypeError:  # older Pallas without pipeline_mode
        return pl.BlockSpec(shape, lambda i: (0, 0))


def prepare_params(params):
    """One-time transform (outside the per-call path): pre-transpose weights
    and cast them to bf16 for the MXU; biases / LN params stay f32."""
    FF, H = params["w1"].shape
    return {
        "w1_t": params["w1"].T.astype(jnp.bfloat16),          # (H, FF)
        "b1": params["b1"].reshape(1, FF).astype(jnp.float32),
        "w2_t": params["w2"].T.astype(jnp.bfloat16),           # (FF, H)
        "b2": params["b2"].reshape(1, H).astype(jnp.float32),
        "gamma": params["gamma"].reshape(1, H).astype(jnp.float32),
        "beta": params["beta"].reshape(1, H).astype(jnp.float32),
    }


# ----------------------------------------------------------------------------
# Wrapper
# ----------------------------------------------------------------------------
def feed_forward(x, prepped, *, block_rows=512):
    """x: (..., H) float32 — any leading batch dims, like the PyTorch module.

    Production note: H and FF should be multiples of 128 for lane-dense
    (unmasked) stores; pad the hidden dims once if the model's aren't.
    """
    orig_shape = x.shape
    H = orig_shape[-1]
    FF = prepped["w1_t"].shape[1]

    # bf16 streamed activations (halves HBM traffic; kernel accumulates f32).
    x2 = x.reshape(-1, H).astype(jnp.bfloat16)
    N = x2.shape[0]

    # Row block: as large as practical, aligned to 8 sublanes.
    R = max(8, min(block_rows, N))
    R = ((R + 7) // 8) * 8
    n_blocks = pl.cdiv(N, R)
    # With dimension_semantics=("parallel",) the row-block axis is sharded
    # across TensorCores on v7x; make sure there are >= 2 blocks.
    if n_blocks == 1 and N >= 16:
        R = ((((N + 1) // 2) + 7) // 8) * 8
        n_blocks = pl.cdiv(N, R)
    Np = n_blocks * R
    if Np != N:
        x2 = jnp.pad(x2, ((0, Np - N), (0, 0)))

    out = pl.pallas_call(
        ffn_kernel,
        out_shape=jax.ShapeDtypeStruct((Np, H), jnp.float32),
        grid=(n_blocks,),
        in_specs=[
            pl.BlockSpec((R, H), lambda i: (i, 0)),   # x rows (streamed, bf16)
            _resident_spec((H, FF)),                  # W1^T   (resident, bf16)
            _resident_spec((1, FF)),                  # b1
            _resident_spec((FF, H)),                  # W2^T   (resident, bf16)
            _resident_spec((1, H)),                   # b2
            _resident_spec((1, H)),                   # ln gamma
            _resident_spec((1, H)),                   # ln beta
        ],
        out_specs=pl.BlockSpec((R, H), lambda i: (i, 0)),
        compiler_params=pltpu.CompilerParams(
            dimension_semantics=("parallel",),        # megacore / 2-TC split
            vmem_limit_bytes=_vmem_limit_bytes()),
    )(x2, prepped["w1_t"], prepped["b1"], prepped["w2_t"], prepped["b2"],
      prepped["gamma"], prepped["beta"])

    if Np != N:
        out = out[:N]
    return out.reshape(orig_shape)


# ----------------------------------------------------------------------------
# Deterministic parameters (mirrors nn.Linear / nn.LayerNorm shapes)
# ----------------------------------------------------------------------------
def make_params(hidden_dim, ff_dim, key):
    ks = jax.random.split(key, 6)
    return {
        "w1": 0.05 * jax.random.normal(ks[0], (ff_dim, hidden_dim), jnp.float32),
        "b1": 0.05 * jax.random.normal(ks[1], (ff_dim,), jnp.float32),
        "w2": 0.05 * jax.random.normal(ks[2], (hidden_dim, ff_dim), jnp.float32),
        "b2": 0.05 * jax.random.normal(ks[3], (hidden_dim,), jnp.float32),
        "gamma": 1.0 + 0.05 * jax.random.normal(ks[4], (hidden_dim,), jnp.float32),
        "beta": 0.05 * jax.random.normal(ks[5], (hidden_dim,), jnp.float32),
    }


# ----------------------------------------------------------------------------
# Pure-JAX reference with the same bf16-matmul / f32-everything-else numerics
# (exact erf GELU, like torch.nn.GELU default)
# ----------------------------------------------------------------------------
def feed_forward_ref(x, params):
    xb = x.astype(jnp.bfloat16)
    w1_t = params["w1"].T.astype(jnp.bfloat16)
    w2_t = params["w2"].T.astype(jnp.bfloat16)
    h = jnp.dot(xb, w1_t, preferred_element_type=jnp.float32) + params["b1"]
    h = 0.5 * h * (1.0 + jax.scipy.special.erf(h * _INV_SQRT2))
    y = jnp.dot(h.astype(jnp.bfloat16), w2_t,
                preferred_element_type=jnp.float32) + params["b2"]
    r = y + xb.astype(jnp.float32)
    mean = jnp.mean(r, axis=-1, keepdims=True)
    var = jnp.mean(jnp.square(r - mean), axis=-1, keepdims=True)
    n = (r - mean) * jax.lax.rsqrt(var + 1e-5)
    return n * params["gamma"] + params["beta"]


if __name__ == "__main__":
    B, S, T, H = 2, 8, 4, 32       # batch, seq_len, tokens_per_frame, hidden
    FF = 4 * H                     # default ff_dim = hidden_dim * 4

    key = jax.random.PRNGKey(0)
    kx, kp = jax.random.split(key)
    x = jax.random.normal(kx, (B, S, T, H), jnp.float32)
    params = make_params(H, FF, kp)
    prepped = prepare_params(params)

    out = feed_forward(x, prepped)          # N=64 rows -> 2 blocks of 32 rows
    out = jax.block_until_ready(out)

    ref = feed_forward_ref(x, params)
    assert out.shape == x.shape
    max_err = float(jnp.max(jnp.abs(out - ref)))
    assert jnp.allclose(out, ref, atol=1e-2, rtol=1e-2), (
        f"mismatch vs JAX reference (max abs err {max_err})")

    print("KERNEL_OK")
</pallas_src>

<mosaic_0001>
module attributes {stable_mosaic.version = 11 : i64} {
  func.func @ffn_kernel(%arg0: i32, %arg1: memref<32x32xbf16, #tpu.memory_space<vmem>>, %arg2: memref<32x128xbf16, #tpu.memory_space<vmem>>, %arg3: memref<1x128xf32, #tpu.memory_space<vmem>>, %arg4: memref<128x32xbf16, #tpu.memory_space<vmem>>, %arg5: memref<1x32xf32, #tpu.memory_space<vmem>>, %arg6: memref<1x32xf32, #tpu.memory_space<vmem>>, %arg7: memref<1x32xf32, #tpu.memory_space<vmem>>, %arg8: memref<32x32xf32, #tpu.memory_space<vmem>>) attributes {dimension_semantics = [#tpu.dimension_semantics<parallel>], iteration_bounds = array<i64: 2>, scalar_prefetch = 0 : i64, scratch_operands = 0 : i64, tpu.core_type = #tpu.core_type<tc>, window_params = [{transform_indices = @transform_0, window_bounds = array<i64: 32, 32>}, {pipeline_mode = #tpu.pipeline_mode<synchronous>, transform_indices = @transform_1, window_bounds = array<i64: 32, 128>}, {pipeline_mode = #tpu.pipeline_mode<synchronous>, transform_indices = @transform_2, window_bounds = array<i64: 1, 128>}, {pipeline_mode = #tpu.pipeline_mode<synchronous>, transform_indices = @transform_3, window_bounds = array<i64: 128, 32>}, {pipeline_mode = #tpu.pipeline_mode<synchronous>, transform_indices = @transform_4, window_bounds = array<i64: 1, 32>}, {pipeline_mode = #tpu.pipeline_mode<synchronous>, transform_indices = @transform_5, window_bounds = array<i64: 1, 32>}, {pipeline_mode = #tpu.pipeline_mode<synchronous>, transform_indices = @transform_6, window_bounds = array<i64: 1, 32>}, {transform_indices = @transform_7, window_bounds = array<i64: 32, 32>}]} {
    %c0 = arith.constant 0 : index
    %c0_0 = arith.constant 0 : index
    %0 = vector.load %arg1[%c0, %c0_0] : memref<32x32xbf16, #tpu.memory_space<vmem>>, vector<32x32xbf16>
    %c0_1 = arith.constant 0 : index
    %c0_2 = arith.constant 0 : index
    %1 = vector.load %arg2[%c0_1, %c0_2] : memref<32x128xbf16, #tpu.memory_space<vmem>>, vector<32x128xbf16>
    %cst = arith.constant dense<0.000000e+00> : vector<32x128xf32>
    %2 = tpu.matmul %0, %1, %cst {dimension_numbers = #tpu.dot_dimension_numbers<[1], [0], [0], [1], [0, 0, 1, 1], [], []>} : vector<32x32xbf16>, vector<32x128xbf16>, vector<32x128xf32> -> vector<32x128xf32>
    %c0_3 = arith.constant 0 : index
    %c0_4 = arith.constant 0 : index
    %3 = vector.load %arg3[%c0_3, %c0_4] : memref<1x128xf32, #tpu.memory_space<vmem>>, vector<1x128xf32>
    %4 = vector.broadcast %3 : vector<1x128xf32> to vector<32x128xf32>
    %5 = arith.addf %2, %4 : vector<32x128xf32>
    %cst_5 = arith.constant 5.000000e-01 : f32
    %6 = vector.broadcast %cst_5 : f32 to vector<32x128xf32>
    %7 = arith.mulf %6, %5 : vector<32x128xf32>
    %cst_6 = arith.constant 0.707106769 : f32
    %8 = vector.broadcast %cst_6 : f32 to vector<32x128xf32>
    %9 = arith.mulf %5, %8 : vector<32x128xf32>
    %10 = math.absf %9 : vector<32x128xf32>
    %cst_7 = arith.constant 0.327591091 : f32
    %11 = vector.broadcast %cst_7 : f32 to vector<32x128xf32>
    %12 = arith.mulf %11, %10 : vector<32x128xf32>
    %cst_8 = arith.constant 1.000000e+00 : f32
    %13 = vector.broadcast %cst_8 : f32 to vector<32x128xf32>
    %14 = arith.addf %13, %12 : vector<32x128xf32>
    %15 = tpu.reciprocal %14 {approx = true} : vector<32x128xf32> -> vector<32x128xf32>
    %cst_9 = arith.constant 1.06140542 : f32
    %16 = vector.broadcast %cst_9 : f32 to vector<32x128xf32>
    %17 = arith.mulf %16, %15 : vector<32x128xf32>
    %cst_10 = arith.constant -1.45315206 : f32
    %18 = vector.broadcast %cst_10 : f32 to vector<32x128xf32>
    %19 = arith.addf %17, %18 : vector<32x128xf32>
    %20 = arith.mulf %19, %15 : vector<32x128xf32>
    %cst_11 = arith.constant 1.42141378 : f32
    %21 = vector.broadcast %cst_11 : f32 to vector<32x128xf32>
    %22 = arith.addf %20, %21 : vector<32x128xf32>
    %23 = arith.mulf %22, %15 : vector<32x128xf32>
    %cst_12 = arith.constant -0.284496725 : f32
    %24 = vector.broadcast %cst_12 : f32 to vector<32x128xf32>
    %25 = arith.addf %23, %24 : vector<32x128xf32>
    %26 = arith.mulf %25, %15 : vector<32x128xf32>
    %cst_13 = arith.constant 0.254829586 : f32
    %27 = vector.broadcast %cst_13 : f32 to vector<32x128xf32>
    %28 = arith.addf %26, %27 : vector<32x128xf32>
    %29 = arith.mulf %28, %15 : vector<32x128xf32>
    %cst_14 = arith.constant 0.000000e+00 : f32
    %30 = vector.broadcast %cst_14 : f32 to vector<32x128xf32>
    %31 = arith.subf %30, %10 : vector<32x128xf32>
    %32 = arith.mulf %31, %10 : vector<32x128xf32>
    %33 = math.exp %32 : vector<32x128xf32>
    %34 = arith.mulf %29, %33 : vector<32x128xf32>
    %cst_15 = arith.constant 1.000000e+00 : f32
    %35 = vector.broadcast %cst_15 : f32 to vector<32x128xf32>
    %36 = arith.subf %35, %34 : vector<32x128xf32>
    %cst_16 = arith.constant 0.000000e+00 : f32
    %37 = vector.broadcast %cst_16 : f32 to vector<32x128xf32>
    %38 = arith.cmpf oge, %9, %37 : vector<32x128xf32>
    %cst_17 = arith.constant 0.000000e+00 : f32
    %39 = vector.broadcast %cst_17 : f32 to vector<32x128xf32>
    %40 = arith.subf %39, %36 : vector<32x128xf32>
    %41 = arith.select %38, %36, %40 : vector<32x128xi1>, vector<32x128xf32>
    %cst_18 = arith.constant 1.000000e+00 : f32
    %42 = vector.broadcast %cst_18 : f32 to vector<32x128xf32>
    %43 = arith.addf %42, %41 : vector<32x128xf32>
    %44 = arith.mulf %7, %43 : vector<32x128xf32>
    %45 = arith.truncf %44 : vector<32x128xf32> to vector<32x128xbf16>
    %c0_19 = arith.constant 0 : index
    %c0_20 = arith.constant 0 : index
    %46 = vector.load %arg4[%c0_19, %c0_20] : memref<128x32xbf16, #tpu.memory_space<vmem>>, vector<128x32xbf16>
    %cst_21 = arith.constant dense<0.000000e+00> : vector<32x32xf32>
    %47 = tpu.matmul %45, %46, %cst_21 {dimension_numbers = #tpu.dot_dimension_numbers<[1], [0], [0], [1], [0, 0, 1, 1], [], []>} : vector<32x128xbf16>, vector<128x32xbf16>, vector<32x32xf32> -> vector<32x32xf32>
    %c0_22 = arith.constant 0 : index
    %c0_23 = arith.constant 0 : index
    %48 = vector.load %arg5[%c0_22, %c0_23] : memref<1x32xf32, #tpu.memory_space<vmem>>, vector<1x32xf32>
    %49 = vector.broadcast %48 : vector<1x32xf32> to vector<32x32xf32>
    %50 = arith.addf %47, %49 : vector<32x32xf32>
    %51 = arith.extf %0 : vector<32x32xbf16> to vector<32x32xf32>
    %52 = arith.addf %50, %51 : vector<32x32xf32>
    %cst_24 = arith.constant dense<0.000000e+00> : vector<32xf32>
    %53 = vector.multi_reduction <add>, %52, %cst_24 [1] : vector<32x32xf32> to vector<32xf32>
    %54 = vector.shape_cast %53 : vector<32xf32> to vector<32x1xf32>
    %cst_25 = arith.constant 3.200000e+01 : f32
    %55 = vector.broadcast %cst_25 : f32 to vector<32x1xf32>
    %56 = arith.divf %54, %55 : vector<32x1xf32>
    %57 = arith.mulf %52, %52 : vector<32x32xf32>
    %cst_26 = arith.constant dense<0.000000e+00> : vector<32xf32>
    %58 = vector.multi_reduction <add>, %57, %cst_26 [1] : vector<32x32xf32> to vector<32xf32>
    %59 = vector.shape_cast %58 : vector<32xf32> to vector<32x1xf32>
    %cst_27 = arith.constant 3.200000e+01 : f32
    %60 = vector.broadcast %cst_27 : f32 to vector<32x1xf32>
    %61 = arith.divf %59, %60 : vector<32x1xf32>
    %62 = arith.mulf %56, %56 : vector<32x1xf32>
    %63 = arith.subf %61, %62 : vector<32x1xf32>
    %64 = vector.broadcast %56 : vector<32x1xf32> to vector<32x32xf32>
    %65 = arith.subf %52, %64 : vector<32x32xf32>
    %cst_28 = arith.constant 9.99999974E-6 : f32
    %66 = vector.broadcast %cst_28 : f32 to vector<32x1xf32>
    %67 = arith.addf %63, %66 : vector<32x1xf32>
    %68 = math.rsqrt %67 : vector<32x1xf32>
    %69 = vector.broadcast %68 : vector<32x1xf32> to vector<32x32xf32>
    %70 = arith.mulf %65, %69 : vector<32x32xf32>
    %c0_29 = arith.constant 0 : index
    %c0_30 = arith.constant 0 : index
    %71 = vector.load %arg6[%c0_29, %c0_30] : memref<1x32xf32, #tpu.memory_space<vmem>>, vector<1x32xf32>
    %72 = vector.broadcast %71 : vector<1x32xf32> to vector<32x32xf32>
    %73 = arith.mulf %70, %72 : vector<32x32xf32>
    %c0_31 = arith.constant 0 : index
    %c0_32 = arith.constant 0 : index
    %74 = vector.load %arg7[%c0_31, %c0_32] : memref<1x32xf32, #tpu.memory_space<vmem>>, vector<1x32xf32>
    %75 = vector.broadcast %74 : vector<1x32xf32> to vector<32x32xf32>
    %76 = arith.addf %73, %75 : vector<32x32xf32>
    %c0_33 = arith.constant 0 : index
    %c0_34 = arith.constant 0 : index
    %77 = vector.load %arg8[%c0_33, %c0_34] : memref<32x32xf32, #tpu.memory_space<vmem>>, vector<32x32xf32>
    tpu.vector_store %arg8[%c0_33, %c0_34], %76 {strides = array<i32>} : memref<32x32xf32, #tpu.memory_space<vmem>>, vector<32x32xf32>,
    return
  }
  func.func @transform_0(%arg0: i32) -> (i32, i32) {
    %c0_i32 = arith.constant 0 : i32
    %c0_i32_0 = arith.constant 0 : i32
    return %arg0, %c0_i32 : i32, i32
  }
  func.func @transform_1(%arg0: i32) -> (i32, i32) {
    %c0_i32 = arith.constant 0 : i32
    %c0_i32_0 = arith.constant 0 : i32
    %c0_i32_1 = arith.constant 0 : i32
    return %c0_i32, %c0_i32_0 : i32, i32
  }
  func.func @transform_2(%arg0: i32) -> (i32, i32) {
    %c0_i32 = arith.constant 0 : i32
    %c0_i32_0 = arith.constant 0 : i32
    %c0_i32_1 = arith.constant 0 : i32
    return %c0_i32, %c0_i32_0 : i32, i32
  }
  func.func @transform_3(%arg0: i32) -> (i32, i32) {
    %c0_i32 = arith.constant 0 : i32
    %c0_i32_0 = arith.constant 0 : i32
    %c0_i32_1 = arith.constant 0 : i32
    return %c0_i32, %c0_i32_0 : i32, i32
  }
  func.func @transform_4(%arg0: i32) -> (i32, i32) {
    %c0_i32 = arith.constant 0 : i32
    %c0_i32_0 = arith.constant 0 : i32
    %c0_i32_1 = arith.constant 0 : i32
    return %c0_i32, %c0_i32_0 : i32, i32
  }
  func.func @transform_5(%arg0: i32) -> (i32, i32) {
    %c0_i32 = arith.constant 0 : i32
    %c0_i32_0 = arith.constant 0 : i32
    %c0_i32_1 = arith.constant 0 : i32
    return %c0_i32, %c0_i32_0 : i32, i32
  }
  func.func @transform_6(%arg0: i32) -> (i32, i32) {
    %c0_i32 = arith.constant 0 : i32
    %c0_i32_0 = arith.constant 0 : i32
    %c0_i32_1 = arith.constant 0 : i32
    return %c0_i32, %c0_i32_0 : i32, i32
  }
  func.func @transform_7(%arg0: i32) -> (i32, i32) {
    %c0_i32 = arith.constant 0 : i32
    %c0_i32_0 = arith.constant 0 : i32
    return %arg0, %c0_i32 : i32, i32
  }
}

</mosaic_0001>

<bundles_post_ra>
// kernel: tpu_custom_call.1
= control target key start
LH: loop header
LB: loop body
LE: loop exit
PB: predicated region body
PF: predicated region fallthrough
CT: control target
= control target key end

     0   :  { %s918_s24 = smov 0   ;;  %s1055_s0 = inlined_call_operand.vmem [shape: bf16[64,32], index: 0, kind: input, shape index: {}]   ;;  %s1056_s1 = inlined_call_operand.vmem [shape: bf16[32,128], index: 1, kind: input, shape index: {}]   ;;  %s1057_s2 = inlined_call_operand.vmem [shape: f32[1,128], index: 2, kind: input, shape index: {}]   ;;  %s1058_s3 = inlined_call_operand.vmem [shape: bf16[128,32], index: 3, kind: input, shape index: {}]   ;;  %s1059_s4 = inlined_call_operand.vmem [shape: f32[1,32], index: 4, kind: input, shape index: {}]   ;;  %s1060_s5 = inlined_call_operand.vmem [shape: f32[1,32], index: 5, kind: input, shape index: {}]   ;;  %s1061_s6 = inlined_call_operand.vmem [shape: f32[1,32], index: 6, kind: input, shape index: {}]   ;;  %s1062_s7 = inlined_call_operand.vmem [shape: f32[64,32], index: 7, kind: output, shape index: {}]  }
   0x1 LB: > { %s753_s25 = sadd.s32 4294967295, %s876_s24   ;;  %p757_p0 = scmp.ge.s32.totalorder %s876_s24, 1  ;;  %s876_s24 = sphi %s918_s24, %s17_s24  }
   0x2   : > { %p238_p1 = scmp.lt.s32.totalorder %s876_s24, 3 }
   0x4   : > { %p239_p2 = pnand %p757_p0, %p238_p1 }
   0x5   : > { %v832_v0 = vld [vmem:[%s1056_s1] sm:$0xff] (!%p239_p2)   ;;  %s758_s28 = sshll.u32 (!%p239_p2), %s753_s25, 2  ;;  %v833_v1 = vld [vmem:[%s1056_s1 + $0x8] sm:$0xff] (!%p239_p2)   ;;  %vm320_vm0 = vcmask (!%p239_p2), 261120   ;;  %v838_v6 = vld [vmem:[%s1058_s3 + $0x10] sm:$0xff] (!%p239_p2)  }
   0x6   : > { %242 = sbr.rel (%p239_p2) target bundleno = 682 (0x2aa), region = 48  ;;  %p271_p3 = scmp.lt.s32.totalorder (!%p239_p2), %s758_s28, 7  ;;  %796 = vmatprep.subr.bf16.mxu0 (!%p239_p2), %v832_v0  ;;  %v836_v4 = vld [vmem:[%s1058_s3] sm:$0xff] (!%p239_p2)   ;;  %v837_v5 = vld [vmem:[%s1058_s3 + $0x8] sm:$0xff] (!%p239_p2)   ;;  %v839_v7 = vld [vmem:[%s1058_s3 + $0x18] sm:$0xff] (!%p239_p2)  }
   0x7   : > { %797 = vmatpush3.bf16.msra.mxu0 (!%p239_p2), %v832_v0  ;;  %804 = vmatprep.subr.bf16.mxu1 (!%p239_p2), %v836_v4  ;;  %v840_v8 = vld [vmem:[%s1058_s3 + $0x20] sm:$0xff] (!%p239_p2)   ;;  %v841_v9 = vld [vmem:[%s1058_s3 + $0x28] sm:$0xff] (!%p239_p2)   ;;  %v842_v10 = vld [vmem:[%s1058_s3 + $0x30] sm:$0xff] (!%p239_p2)  }
   0x8   : > { %798 = vmatprep.subr.bf16.mxu0 (!%p239_p2), %v833_v1  ;;  %805 = vmatpush3.bf16.msra.mxu1 (!%p239_p2), %v836_v4  ;;  %v843_v11 = vld [vmem:[%s1058_s3 + $0x38] sm:$0xff] (!%p239_p2)   ;;  %v762_v12 = vld [vmem:[%s1057_s2] ss:$0 sm:$0xff] (!%p239_p2) }
   0x9   : > { %806 = vmatprep.subr.bf16.mxu1 (!%p239_p2), %v837_v5 }
   0xb   : > { %799 = vmatpush3.bf16.msra.mxu0 (!%p239_p2), %v833_v1 }
   0xc   : > { %807 = vmatpush3.bf16.msra.mxu1 (!%p239_p2), %v837_v5 }
   0xd   : > { %s1064_s28 = smov (!%p271_p3, %s758_s28), 7  ;;  %808 = vmatprep.subr.bf16.mxu1 %v838_v6 }
   0xe   : > { %s759_s8 = sshll.u32 %s1064_s28, 2  ;;  %s761_s13 = sshll.u32 %s1064_s28, 3 }
   0xf   : > { %s274_s11 = scalar_lea.vmem %s1055_s0, %s759_s8  ;;  %s280_s18 = scalar_lea.vmem %s1062_s7, %s761_s13 }
  0x10   : > { %v938_v2 = vld [vmem:[%s274_s11] sm:$0xff]   ;;  %v940_v3 = vld [vmem:[%s274_s11 + $0x8] sm:$0xff]   ;;  %809 = vmatpush3.bf16.msra.mxu1 %v838_v6 }
  0x11   : > { %800 = vmatprep.mubr.msk.bf16.mxu0 %vm320_vm0, %v938_v2  ;;  %810 = vmatprep.subr.bf16.mxu1 %v839_v7 }
  0x12   : > { %801 = vmatmul.mubr.msk.bf16.vlgmr.msra.gmra.mrb[0].mxu0 %vm320_vm0, %v940_v3 }
  0x14   : > { %811 = vmatpush3.bf16.msra.mxu1 %v839_v7 }
  0x15   : > { %812 = vmatprep.subr.bf16.mxu1 %v840_v8 }
  0x18   : > { %813 = vmatpush3.bf16.msra.mxu1 %v840_v8 }
  0x19   : > { %814 = vmatprep.subr.bf16.mxu1 %v841_v9 }
  0x1c   : > { %815 = vmatpush3.bf16.msra.mxu1 %v841_v9 }
  0x1d   : > { %816 = vmatprep.subr.bf16.mxu1 %v842_v10 }
  0x20   : > { %817 = vmatpush3.bf16.msra.mxu1 %v842_v10 }
  0x21   : > { %818 = vmatprep.subr.bf16.mxu1 %v843_v11 }
  0x24   : > { %819 = vmatpush3.bf16.msra.mxu1 %v843_v11 }
  0xe5   : > { %v802_v13 = vpop.f32.mrb[0].mxu0 }
  0xe6   : > { %v973_v14 = vadd.f32 %v802_v13, %v762_v12  ;;  %v361_v15 = vpop.f32.mrb[1].mxu0 }
  0xe7   : > { %v975_v16 = vadd.f32 %v762_v12, %v361_v15  ;;  %v803_v17 = vpop.f32.mrb[2].mxu0 }
  0xe8   : > { %v978_v18 = vmul.f32 0.70710677, %v973_v14  ;;  %v980_v19 = vadd.f32 %v803_v17, %v762_v12  ;;  %v364_v20 = vpop.f32.mrb[3].mxu0 }
  0xe9   : > { %v983_v21 = vmul.f32 0.70710677, %v975_v16  ;;  %v985_v22 = vadd.f32 %v762_v12, %v364_v20 }
  0xea   : > { %v386_v23 = vand.u32 2147483647, %v978_v18  ;;  %v989_v24 = vmul.f32 0.70710677, %v980_v19  ;;  %vm462_vm1 = vcmp.ge.f32.partialorder %v978_v18, 0.0 }
  0xeb   : > { %v384_v25 = vand.u32 2147483647, %v983_v21  ;;  %v993_v26 = vmul.f32 0.70710677, %v985_v22  ;;  %vm460_vm2 = vcmp.ge.f32.partialorder %v983_v21, 0.0 }
  0xec   : > { %v390_v27 = vmul.f32 0.3275911, %v386_v23  ;;  %v387_v28 = vand.u32 2147483647, %v989_v24  ;;  %v438_v37 = vsub.f32 0.0, %v386_v23  ;;  %vm463_vm3 = vcmp.ge.f32.partialorder %v989_v24, 0.0 }
  0xed   : > { %v388_v29 = vmul.f32 0.3275911, %v384_v25  ;;  %v385_v30 = vand.u32 2147483647, %v993_v26  ;;  %v436_v38 = vsub.f32 0.0, %v384_v25  ;;  %vm461_vm4 = vcmp.ge.f32.partialorder %v993_v26, 0.0 }
  0xee   : > { %v394_v31 = vadd.f32 1.0, %v390_v27  ;;  %v391_v32 = vmul.f32 0.3275911, %v387_v28  ;;  %v442_v40 = vmul.f32 %v438_v37, %v386_v23  ;;  %v439_v41 = vsub.f32 0.0, %v387_v28 }
  0xef   : > { %v392_v33 = vadd.f32 1.0, %v388_v29  ;;  %v389_v34 = vmul.f32 0.3275911, %v385_v30  ;;  %v440_v44 = vmul.f32 %v436_v38, %v384_v25  ;;  %v437_v45 = vsub.f32 0.0, %v385_v30 }
  0xf0   : > { %846 = vrcp.f32 %v394_v31  ;;  %v395_v35 = vadd.f32 1.0, %v391_v32  ;;  %v448_v49 = vmul.f32 1.442695, %v442_v40  ;;  %v443_v50 = vmul.f32 %v439_v41, %v387_v28 }
  0xf1   : > { %848 = vrcp.f32 %v392_v33  ;;  %v393_v36 = vadd.f32 1.0, %v389_v34  ;;  %v444_v53 = vmul.f32 1.442695, %v440_v44  ;;  %v441_v56 = vmul.f32 %v437_v45, %v385_v30 }
  0xf2   : > { %850 = vrcp.f32 %v395_v35  ;;  %v450_v61 = vmul.f32 1.442695, %v443_v50  ;;  %v604_v26 = vunpack.c.l.bf16 %v940_v3 }
  0xf3   : > { %852 = vrcp.f32 %v393_v36  ;;  %v446_v4 = vmul.f32 1.442695, %v441_v56 }
  0xf4   : > { %854 = vpow2.f32 %v448_v49 }
  0xf5   : > { %856 = vpow2.f32 %v444_v53 }
  0xf6   : > { %858 = vpow2.f32 %v450_v61  ;;  %v377_v61 = vmul.f32 0.5, %v985_v22  ;;  %v603_v22 = vunpack.c.h.bf16 %v938_v2 }
  0xf7   : > { %860 = vpow2.f32 %v446_v4 }
  0xfa   : > { %v847_v39 = vpop.eup %846 }
  0xfb   : > { %v849_v42 = vpop.eup %848  ;;  %v402_v43 = vmul.f32 1.0614054, %v847_v39 }
  0xfc   : > { %v400_v46 = vmul.f32 1.0614054, %v849_v42  ;;  %v851_v48 = vpop.eup %850 }
  0xfd   : > { %v406_v47 = vadd.f32 -1.4531521, %v402_v43  ;;  %v403_v54 = vmul.f32 1.0614054, %v851_v48  ;;  %v853_v55 = vpop.eup %852 }
  0xfe   : > { %v404_v51 = vadd.f32 -1.4531521, %v400_v46  ;;  %v401_v60 = vmul.f32 1.0614054, %v853_v55  ;;  %v855_v29 = vpop.eup %854 }
  0xff   : > { %v410_v52 = vmul.f32 %v847_v39, %v406_v47  ;;  %v407_v59 = vadd.f32 -1.4531521, %v403_v54  ;;  %v857_v31 = vpop.eup %856 }
 0x100   : > { %v408_v57 = vmul.f32 %v849_v42, %v404_v51  ;;  %v405_v1 = vadd.f32 -1.4531521, %v401_v60  ;;  %v859_v40 = vpop.eup %858 }
 0x101   : > { %v414_v58 = vadd.f32 1.4214138, %v410_v52  ;;  %v411_v0 = vmul.f32 %v851_v48, %v407_v59  ;;  %v861_v46 = vpop.eup %860 }
 0x102   : > { %v412_v62 = vadd.f32 1.4214138, %v408_v57  ;;  %v409_v8 = vmul.f32 %v853_v55, %v405_v1 }
 0x103   : > { %v418_v63 = vmul.f32 %v847_v39, %v414_v58  ;;  %v415_v7 = vadd.f32 1.4214138, %v411_v0  ;;  %v376_v58 = vmul.f32 0.5, %v975_v16  ;;  %v602_v16 = vunpack.c.l.bf16 %v938_v2 }
 0x104   : > { %v416_v5 = vmul.f32 %v849_v42, %v412_v62  ;;  %v413_v12 = vadd.f32 1.4214138, %v409_v8  ;;  %v605_v8 = vunpack.c.h.bf16 %v940_v3 }
 0x105   : > { %v422_v6 = vadd.f32 -0.28449672, %v418_v63  ;;  %v419_v11 = vmul.f32 %v851_v48, %v415_v7 }
 0x106   : > { %v420_v9 = vadd.f32 -0.28449672, %v416_v5  ;;  %v417_v20 = vmul.f32 %v853_v55, %v413_v12 }
 0x107   : > { %v426_v10 = vmul.f32 %v847_v39, %v422_v6  ;;  %v423_v17 = vadd.f32 -0.28449672, %v419_v11 }
 0x108   : > { %v424_v13 = vmul.f32 %v849_v42, %v420_v9  ;;  %v421_v28 = vadd.f32 -0.28449672, %v417_v20 }
 0x109   : > { %v430_v15 = vadd.f32 0.2548296, %v426_v10  ;;  %v427_v27 = vmul.f32 %v851_v48, %v423_v17 }
 0x10a   : > { %v428_v23 = vadd.f32 0.2548296, %v424_v13  ;;  %v425_v34 = vmul.f32 %v853_v55, %v421_v28 }
 0x10b   : > { %v434_v25 = vmul.f32 %v847_v39, %v430_v15  ;;  %v431_v33 = vadd.f32 0.2548296, %v427_v27 }
 0x10c   : > { %v432_v30 = vmul.f32 %v849_v42, %v428_v23  ;;  %v429_v38 = vadd.f32 0.2548296, %v425_v34 }
 0x10d   : > { %v454_v32 = vmul.f32 %v855_v29, %v434_v25  ;;  %v435_v37 = vmul.f32 %v851_v48, %v431_v33  ;;  %v378_v48 = vmul.f32 0.5, %v973_v14 }
 0x10e   : > { %v452_v35 = vmul.f32 %v857_v31, %v432_v30  ;;  %v433_v45 = vmul.f32 %v853_v55, %v429_v38  ;;  %v379_v55 = vmul.f32 0.5, %v980_v19  ;;  %v769_v19 = vld [vmem:[%s1059_s4] ss:$0 sm:$0xff] }
 0x10f   : > { %v458_v36 = vsub.f32 1.0, %v454_v32  ;;  %v455_v44 = vmul.f32 %v859_v40, %v435_v37 }
 0x110   : > { %v456_v41 = vsub.f32 1.0, %v452_v35  ;;  %v453_v42 = vmul.f32 %v861_v46, %v433_v45 }
 0x111   : > { %v466_v43 = vsub.f32 0.0, %v458_v36  ;;  %v459_v49 = vsub.f32 1.0, %v455_v44 }
 0x112   : > { %v464_v39 = vsub.f32 0.0, %v456_v41  ;;  %v457_v51 = vsub.f32 1.0, %v453_v42 }
 0x113   : > { %v470_v47 = vsel %vm462_vm1, %v458_v36, %v466_v43  ;;  %v467_v50 = vsub.f32 0.0, %v459_v49 }
 0x114   : > { %v468_v52 = vsel %vm460_vm2, %v456_v41, %v464_v39  ;;  %v474_v53 = vadd.f32 1.0, %v470_v47  ;;  %v465_v56 = vsub.f32 0.0, %v457_v51 }
 0x115   : > { %v471_v54 = vsel %vm463_vm3, %v459_v49, %v467_v50  ;;  %v472_v18 = vadd.f32 1.0, %v468_v52 }
 0x116   : > { %v475_v57 = vadd.f32 1.0, %v471_v54  ;;  %v469_v59 = vsel %vm461_vm4, %v457_v51, %v465_v56  ;;  %v478_v21 = vmul.f32 %v474_v53, %v378_v48 }
 0x117   : > { %v473_v62 = vadd.f32 1.0, %v469_v59  ;;  %v476_v63 = vmul.f32 %v472_v18, %v376_v58 }
 0x118   : > { %v479_v60 = vmul.f32 %v475_v57, %v379_v55 }
 0x119   : > { %v477_v24 = vmul.f32 %v473_v62, %v377_v61  ;;  %v778_v62 = vld [vmem:[%s1060_s5] ss:$0 sm:$0xff] }
 0x11a   : > { %v481_v0 = vpack.c.bf16 %v479_v60, %v478_v21 }
 0x11b   : > { %v480_v14 = vpack.c.bf16 %v477_v24, %v476_v63  ;;  %v779_v24 = vld [vmem:[%s1061_s6] ss:$0 sm:$0xff] }
 0x11d   : > { %820 = vmatprep.mubr.bf16.mxu1 %v480_v14 }
 0x11e   : > { %821 = vmatmul.mubr.bf16.vlgmr.msra.gmra.mrb[0].mxu1 %v481_v0 }
 0x1f1   : > { %v822_v1 = vpop.f32.mrb[0].mxu1 }
 0x1f2   : > { %v596_v4 = vadd.f32 %v822_v1, %v769_v19  ;;  %v587_v5 = vpop.f32.mrb[1].mxu1 }
 0x1f3   : > { %v588_v6 = vadd.f32 %v769_v19, %v587_v5  ;;  %v823_v7 = vpop.f32.mrb[2].mxu1 }
 0x1f4   : > { %v1012_v9 = vadd.f32 %v604_v26, %v596_v4  ;;  %v599_v10 = vadd.f32 %v823_v7, %v769_v19  ;;  %v590_v11 = vpop.f32.mrb[3].mxu1 }
 0x1f5   : > { %v606_v12 = vadd.f32 %v602_v16, %v588_v6  ;;  %v591_v13 = vadd.f32 %v769_v19, %v590_v11 }
 0x1f6   : > { %v616_v15 = vsel %vm320_vm0, %v1012_v9, 0.0  ;;  %v1016_v17 = vadd.f32 %v605_v8, %v599_v10  ;;  %v629_v31 = vmul.f32 %v1012_v9, %v1012_v9 }
 0x1f7   : > { %v1018_v20 = vadd.f32 %v603_v22, %v591_v13  ;;  %617 = vadd.xlane.f32.xlu1 %v616_v15  ;;  %v610_v2 = vsel %vm320_vm0, %v606_v12, 0.0  ;;  %v627_v23 = vmul.f32 %v606_v12, %v606_v12 }
 0x1f8   : > { %611 = vadd.xlane.f32.xlu0 %v610_v2  ;;  %v619_v27 = vsel %vm320_vm0, %v1016_v17, 0.0  ;;  %v630_v29 = vmul.f32 %v1016_v17, %v1016_v17  ;;  %v637_v33 = vsel %vm320_vm0, %v629_v31, 0.0 }
 0x1f9   : > { %v631_v3 = vsel %vm320_vm0, %v627_v23, 0.0  ;;  %v628_v25 = vmul.f32 %v1018_v20, %v1018_v20  ;;  %v613_v30 = vsel %vm320_vm0, %v1018_v20, 0.0 }
 0x1fa   : > { %v640_v32 = vsel %vm320_vm0, %v630_v29, 0.0 }
 0x1fb   : > { %632 = vadd.xlane.f32.xlu1 %v631_v3  ;;  %v634_v28 = vsel %vm320_vm0, %v628_v25, 0.0 }
 0x1fc   : > { %620 = vadd.xlane.f32.xlu0 %v619_v27 }
 0x1ff   : > { %635 = vadd.xlane.f32.xlu1 %v634_v28 }
 0x200   : > { %614 = vadd.xlane.f32.xlu0 %v613_v30 }
 0x203   : > { %641 = vadd.xlane.f32.xlu1 %v640_v32 }
 0x204   : > { %638 = vadd.xlane.f32.xlu0 %v637_v33 }
 0x284   : > { %v618_v34 = vpop.xlane.xlu1 %617 }
 0x285   : > { %v612_v35 = vpop.xlane.xlu0 %611  ;;  %v625_v47 = vmul.f32 0.03125, %v618_v34 }
 0x286   : > { %v623_v36 = vmul.f32 0.03125, %v612_v35 }
 0x287   : > { %v649_v54 = vmul.f32 %v625_v47, %v625_v47  ;;  %v657_v4 = vsub.f32 %v1012_v9, %v625_v47 }
 0x288   : > { %v647_v37 = vmul.f32 %v623_v36, %v623_v36  ;;  %v633_v38 = vpop.xlane.xlu1 %632  ;;  %v655_v60 = vsub.f32 %v606_v12, %v623_v36 }
 0x289   : > { %v643_v40 = vmul.f32 0.03125, %v633_v38  ;;  %v621_v41 = vpop.xlane.xlu0 %620 }
 0x28a   : > { %v626_v46 = vmul.f32 0.03125, %v621_v41 }
 0x28b   : > { %v651_v43 = vsub.f32 %v643_v40, %v647_v37 }
 0x28c   : > { %v636_v44 = vpop.xlane.xlu1 %635  ;;  %v650_v52 = vmul.f32 %v626_v46, %v626_v46  ;;  %v658_v16 = vsub.f32 %v1016_v17, %v626_v46 }
 0x28d   : > { %v659_v45 = vadd.f32 1e-05, %v651_v43  ;;  %v615_v39 = vpop.xlane.xlu0 %614  ;;  %v644_v42 = vmul.f32 0.03125, %v636_v44 }
 0x28e   : > { %v624_v49 = vmul.f32 0.03125, %v615_v39 }
 0x28f   : > { %862 = vrsqrt.f32 %v659_v45 }
 0x290   : > { %v648_v50 = vmul.f32 %v624_v49, %v624_v49  ;;  %v642_v51 = vpop.xlane.xlu1 %641  ;;  %v656_v19 = vsub.f32 %v1018_v20, %v624_v49 }
 0x291   : > { %v646_v53 = vmul.f32 0.03125, %v642_v51  ;;  %v639_v48 = vpop.xlane.xlu0 %638 }
 0x292   : > { %v652_v56 = vsub.f32 %v644_v42, %v648_v50  ;;  %v645_v55 = vmul.f32 0.03125, %v639_v48 }
 0x293   : > { %v654_v57 = vsub.f32 %v646_v53, %v650_v52 }
 0x294   : > { %v660_v18 = vadd.f32 1e-05, %v652_v56  ;;  %v653_v58 = vsub.f32 %v645_v55, %v649_v54 }
 0x295   : > { %v662_v59 = vadd.f32 1e-05, %v654_v57 }
 0x296   : > { %864 = vrsqrt.f32 %v660_v18  ;;  %v661_v21 = vadd.f32 1e-05, %v653_v58 }
 0x297   : > { %866 = vrsqrt.f32 %v662_v59 }
 0x298   : > { %868 = vrsqrt.f32 %v661_v21 }
 0x299   : > { %v863_v61 = vpop.eup %862 }
 0x29a   : > { %v667_v63 = vmul.f32 %v863_v61, %v655_v60 }
 0x29c   : > { %v678_v0 = vmul.f32 %v778_v62, %v667_v63 }
 0x29e   : > { %v689_v14 = vadd.f32 %v779_v24, %v678_v0 }
 0x2a0   : > { %v865_v26 = vpop.eup %864  ;;  %693 = vst.msk [vmem:[%s280_s18] sm:$0xff] %vm320_vm0, %v689_v14 }
 0x2a1   : > { %v867_v1 = vpop.eup %866  ;;  %v668_v5 = vmul.f32 %v865_v26, %v656_v19 }
 0x2a2   : > { %v869_v22 = vpop.eup %868  ;;  %v670_v6 = vmul.f32 %v867_v1, %v658_v16 }
 0x2a3   : > { %v679_v7 = vmul.f32 %v778_v62, %v668_v5  ;;  %v669_v8 = vmul.f32 %v869_v22, %v657_v4 }
 0x2a4   : > { %v681_v10 = vmul.f32 %v778_v62, %v670_v6 }
 0x2a5   : > { %v690_v11 = vadd.f32 %v779_v24, %v679_v7  ;;  %v680_v12 = vmul.f32 %v778_v62, %v669_v8 }
 0x2a6   : > { %v692_v15 = vadd.f32 %v779_v24, %v681_v10 }
 0x2a7   : > { %694 = vst.msk [vmem:[%s280_s18 + $0x8] sm:$0xff] %vm320_vm0, %v690_v11  ;;  %v691_v13 = vadd.f32 %v779_v24, %v680_v12 }
 0x2a8   : > { %696 = vst.msk [vmem:[%s280_s18 + $0x18] sm:$0xff] %vm320_vm0, %v692_v15 }
 0x2a9   : > { %695 = vst.msk [vmem:[%s280_s18 + $0x10] sm:$0xff] %vm320_vm0, %v691_v13 }
 0x2aa PF: > { %s17_s24 = sadd.s32 1, %s876_s24  }
 0x2ab   : > { %p14_p4 = scmp.ge.s32.totalorder %s17_s24, 4  }
 0x2ad   :  { %16 = sbr.rel (!%p14_p4) target bundleno = 1 (0x1), region = 78 }

</bundles_post_ra>
